<compile_context>
chip_gen: v7x
topology: tpu7x:2x2x1
jax: 0.10.0
libtpu: 0.0.40
codegen_flags: <defaults>
</compile_context>

<pallas_src>
import functools
import math

import jax
import jax.numpy as jnp
from jax.experimental import pallas as pl
from jax.experimental.pallas import tpu as pltpu

EPS = 1e-5


def _round_up(a, b):
    return (a + b - 1) // b * b


def _conv_stats_kernel(patches_ref, w_ref, sum_ref, sq_ref):
    # Pass 1: per-tile matmul + per-channel sum / sum-of-squares accumulation.
    @pl.when(pl.program_id(0) == 0)
    def _():
        sum_ref[...] = jnp.zeros_like(sum_ref)
        sq_ref[...] = jnp.zeros_like(sq_ref)

    conv = jnp.dot(patches_ref[...], w_ref[...],
                   preferred_element_type=jnp.float32)       # (block_m, Pp) f32
    sum_ref[...] += jnp.sum(conv, axis=0, keepdims=True)
    sq_ref[...] += jnp.sum(conv * conv, axis=0, keepdims=True)


def _conv_norm_kernel(patches_ref, w_ref, sum_ref, sq_ref, bias_ref, out_ref,
                      *, inv_m):
    # Pass 2: recompute the tile matmul, normalize with global stats, add bias.
    conv = jnp.dot(patches_ref[...], w_ref[...],
                   preferred_element_type=jnp.float32)       # (block_m, Pp) f32
    mean = sum_ref[...] * inv_m                               # (1, Pp)
    var = sq_ref[...] * inv_m - mean * mean                   # biased variance
    inv_std = jax.lax.rsqrt(var + EPS)
    out_ref[...] = (conv - mean) * inv_std + bias_ref[...]


def conv_bn_bias(x, mask_val, coef, bias, *, padding=1, block_m=512):
    """x: (N, C, H, W) f32. mask_val: (P, C, KH, KW). coef: (P, C, 1, 1).
    bias: (1, P, 1, 1). Returns (N, P, H, W) f32."""
    N, C, H, W = x.shape
    P, _, KH, KW = mask_val.shape
    K = C * KH * KW
    M = N * H * W

    # MaskConv2d weight (mask_bit=1 / BinarizeFn): +/-1 mask * coef.
    mask = (jnp.where(mask_val > 0, 1.0, 0.0) - 0.5) * 2.0
    weight = (mask * coef).reshape(P, K)                      # (P, K) f32

    # im2col (wrapper glue). Feature order (c, kh, kw) matches weight layout.
    # TODO(synk): fold im2col into the kernel (halo'd NHWC blocks + KH*KW
    # shifted matmuls) to avoid the KH*KW activation blow-up in HBM at scale.
    xp = jnp.pad(x, ((0, 0), (0, 0), (padding, padding), (padding, padding)))
    cols = jnp.stack(
        [xp[:, :, kh:kh + H, kw:kw + W] for kh in range(KH) for kw in range(KW)],
        axis=-1)                                              # (N, C, H, W, KH*KW)
    patches = cols.transpose(0, 2, 3, 1, 4).reshape(M, K)

    # Lane-pad only the output channels; K stays at its true size (full-extent
    # block dim). M is padded to a multiple of the tile: the padded zero rows
    # contribute nothing to sum/sumsq, which are divided by the TRUE M.
    Pp = max(128, _round_up(P, 128))
    block_m = min(block_m, _round_up(M, 128))
    Mp = _round_up(M, block_m)
    nm = Mp // block_m

    patches_p = jnp.zeros((Mp, K), jnp.bfloat16).at[:M, :].set(
        patches.astype(jnp.bfloat16))
    w_p = jnp.zeros((K, Pp), jnp.bfloat16).at[:, :P].set(
        weight.T.astype(jnp.bfloat16))
    bias_p = jnp.zeros((1, Pp), jnp.float32).at[0, :P].set(bias.reshape(P))

    patches_spec = pl.BlockSpec((block_m, K), lambda i: (i, 0))
    w_spec = pl.BlockSpec((K, Pp), lambda i: (0, 0))
    vec_spec = pl.BlockSpec((1, Pp), lambda i: (0, 0))

    flops = 2 * Mp * K * Pp

    # ---- Pass 1: per-channel sum / sum-of-squares over all M rows. ----
    ch_sum, ch_sq = pl.pallas_call(
        _conv_stats_kernel,
        out_shape=(jax.ShapeDtypeStruct((1, Pp), jnp.float32),
                   jax.ShapeDtypeStruct((1, Pp), jnp.float32)),
        grid_spec=pltpu.PrefetchScalarGridSpec(
            num_scalar_prefetch=0,
            grid=(nm,),
            in_specs=[patches_spec, w_spec],
            out_specs=[vec_spec, vec_spec]),
        compiler_params=pltpu.CompilerParams(
            dimension_semantics=("arbitrary",)),
        cost_estimate=pl.CostEstimate(
            flops=int(flops), transcendentals=0,
            bytes_accessed=int(Mp * K * 2 + K * Pp * 2 + 2 * Pp * 4)),
    )(patches_p, w_p)

    # ---- Pass 2: normalize + bias (embarrassingly parallel over M tiles). ----
    out = pl.pallas_call(
        functools.partial(_conv_norm_kernel, inv_m=1.0 / M),
        out_shape=jax.ShapeDtypeStruct((Mp, Pp), jnp.float32),
        grid_spec=pltpu.PrefetchScalarGridSpec(
            num_scalar_prefetch=0,
            grid=(nm,),
            in_specs=[patches_spec, w_spec, vec_spec, vec_spec, vec_spec],
            out_specs=pl.BlockSpec((block_m, Pp), lambda i: (i, 0))),
        compiler_params=pltpu.CompilerParams(
            dimension_semantics=("parallel",)),
        cost_estimate=pl.CostEstimate(
            flops=int(flops), transcendentals=int(Pp),
            bytes_accessed=int(Mp * K * 2 + K * Pp * 2 + 3 * Pp * 4
                               + Mp * Pp * 4)),
    )(patches_p, w_p, ch_sum, ch_sq, bias_p)

    # Back to NCHW to match the PyTorch module's interface.  (At real sizes,
    # keep activations NHWC end-to-end and drop this transpose.)
    return out[:M, :P].reshape(N, H, W, P).transpose(0, 3, 1, 2)


if __name__ == "__main__":
    # Small shapes: batch=2, in_planes=4, planes=8, spatial=16x16, 3x3 conv.
    N, C, P, H, W = 2, 4, 8, 16, 16
    key = jax.random.PRNGKey(0)
    k1, k2, k3 = jax.random.split(key, 3)

    x = jax.random.normal(k1, (N, C, H, W), jnp.float32)

    # Deterministic init mirroring MaskConv2d.__init__ / ConvBnBias.__init__:
    mask_val = jax.random.normal(k2, (P, C, 3, 3), jnp.float32)
    stdv = 1.0 / math.sqrt(C * 3 * 3)
    coef = jax.random.uniform(k3, (P, C, 1, 1), jnp.float32, -stdv, stdv)
    bias = jnp.zeros((1, P, 1, 1), jnp.float32)

    # block_m=128 -> 4 M-tiles at this toy size; default (512) at real sizes.
    y = jax.block_until_ready(
        conv_bn_bias(x, mask_val, coef, bias, block_m=128))
    assert y.shape == (N, P, H, W)

    # Reference weight (BinarizeFn mask * coef) and BN(affine=False)+bias.
    mask = (jnp.where(mask_val > 0, 1.0, 0.0) - 0.5) * 2.0
    weight = mask * coef

    def bn_bias(conv):
        mean = conv.mean(axis=(0, 2, 3), keepdims=True)
        var = conv.var(axis=(0, 2, 3), keepdims=True)   # biased, as BN normalizes with
        return (conv - mean) * jax.lax.rsqrt(var + EPS) + bias

    # Reference 1: same numerics as the kernel (bf16 matmul operands, f32
    # accumulation + f32 BN) -> tight tolerance.
    conv_bf16 = jax.lax.conv_general_dilated(
        x.astype(jnp.bfloat16), weight.astype(jnp.bfloat16),
        window_strides=(1, 1), padding=((1, 1), (1, 1)),
        dimension_numbers=("NCHW", "OIHW", "NCHW"),
        preferred_element_type=jnp.float32)
    ref = bn_bias(conv_bf16)
    assert jnp.allclose(y, ref, atol=1e-3, rtol=1e-3), \
        float(jnp.max(jnp.abs(y - ref)))

    # Reference 2: full-f32 PyTorch-equivalent forward; loose bound only on the
    # bf16 matmul rounding.
    conv_f32 = jax.lax.conv_general_dilated(
        x, weight, window_strides=(1, 1), padding=((1, 1), (1, 1)),
        dimension_numbers=("NCHW", "OIHW", "NCHW"))
    ref32 = bn_bias(conv_f32)
    assert float(jnp.max(jnp.abs(y - ref32))) < 5e-2

    print("KERNEL_OK")
</pallas_src>

<mosaic_0001>
module attributes {stable_mosaic.version = 11 : i64} {
  func.func @_conv_stats_kernel(%arg0: i32, %arg1: memref<128x36xbf16, #tpu.memory_space<vmem>>, %arg2: memref<36x128xbf16, #tpu.memory_space<vmem>>, %arg3: memref<1x128xf32, #tpu.memory_space<vmem>>, %arg4: memref<1x128xf32, #tpu.memory_space<vmem>>) attributes {dimension_semantics = [#tpu.dimension_semantics<arbitrary>], iteration_bounds = array<i64: 4>, scalar_prefetch = 0 : i64, scratch_operands = 0 : i64, tpu.core_type = #tpu.core_type<tc>, window_params = [{transform_indices = @transform_0, window_bounds = array<i64: 128, 36>}, {pipeline_mode = #tpu.pipeline_mode<synchronous>, transform_indices = @transform_1, window_bounds = array<i64: 36, 128>}, {pipeline_mode = #tpu.pipeline_mode<synchronous>, transform_indices = @transform_2, window_bounds = array<i64: 1, 128>}, {pipeline_mode = #tpu.pipeline_mode<synchronous>, transform_indices = @transform_3, window_bounds = array<i64: 1, 128>}]} {
    %c0_i32 = arith.constant 0 : i32
    %0 = arith.cmpi eq, %arg0, %c0_i32 : i32
    %1 = arith.extui %0 : i1 to i32
    %c0_i32_0 = arith.constant 0 : i32
    %2 = arith.cmpi ne, %1, %c0_i32_0 : i32
    scf.if %2 {
      %cst_14 = arith.constant 0.000000e+00 : f32
      %17 = vector.broadcast %cst_14 : f32 to vector<1x128xf32>
      %c0_15 = arith.constant 0 : index
      %c0_16 = arith.constant 0 : index
      %18 = vector.load %arg3[%c0_15, %c0_16] : memref<1x128xf32, #tpu.memory_space<vmem>>, vector<1x128xf32>
      tpu.vector_store %arg3[%c0_15, %c0_16], %17 {strides = array<i32>} : memref<1x128xf32, #tpu.memory_space<vmem>>, vector<1x128xf32>,
      %cst_17 = arith.constant 0.000000e+00 : f32
      %19 = vector.broadcast %cst_17 : f32 to vector<1x128xf32>
      %c0_18 = arith.constant 0 : index
      %c0_19 = arith.constant 0 : index
      %20 = vector.load %arg4[%c0_18, %c0_19] : memref<1x128xf32, #tpu.memory_space<vmem>>, vector<1x128xf32>
      tpu.vector_store %arg4[%c0_18, %c0_19], %19 {strides = array<i32>} : memref<1x128xf32, #tpu.memory_space<vmem>>, vector<1x128xf32>,
    } else {
    }
    %c0 = arith.constant 0 : index
    %c0_1 = arith.constant 0 : index
    %3 = vector.load %arg1[%c0, %c0_1] : memref<128x36xbf16, #tpu.memory_space<vmem>>, vector<128x36xbf16>
    %c0_2 = arith.constant 0 : index
    %c0_3 = arith.constant 0 : index
    %4 = vector.load %arg2[%c0_2, %c0_3] : memref<36x128xbf16, #tpu.memory_space<vmem>>, vector<36x128xbf16>
    %cst = arith.constant dense<0.000000e+00> : vector<128x128xf32>
    %5 = tpu.matmul %3, %4, %cst {dimension_numbers = #tpu.dot_dimension_numbers<[1], [0], [0], [1], [0, 0, 1, 1], [], []>} : vector<128x36xbf16>, vector<36x128xbf16>, vector<128x128xf32> -> vector<128x128xf32>
    %c0_4 = arith.constant 0 : index
    %c0_5 = arith.constant 0 : index
    %6 = vector.load %arg3[%c0_4, %c0_5] : memref<1x128xf32, #tpu.memory_space<vmem>>, vector<1x128xf32>
    %cst_6 = arith.constant dense<0.000000e+00> : vector<128xf32>
    %7 = vector.multi_reduction <add>, %5, %cst_6 [0] : vector<128x128xf32> to vector<128xf32>
    %8 = vector.shape_cast %7 : vector<128xf32> to vector<1x128xf32>
    %9 = arith.addf %6, %8 : vector<1x128xf32>
    %c0_7 = arith.constant 0 : index
    %c0_8 = arith.constant 0 : index
    %10 = vector.load %arg3[%c0_7, %c0_8] : memref<1x128xf32, #tpu.memory_space<vmem>>, vector<1x128xf32>
    tpu.vector_store %arg3[%c0_7, %c0_8], %9 {strides = array<i32>} : memref<1x128xf32, #tpu.memory_space<vmem>>, vector<1x128xf32>,
    %c0_9 = arith.constant 0 : index
    %c0_10 = arith.constant 0 : index
    %11 = vector.load %arg4[%c0_9, %c0_10] : memref<1x128xf32, #tpu.memory_space<vmem>>, vector<1x128xf32>
    %12 = arith.mulf %5, %5 : vector<128x128xf32>
    %cst_11 = arith.constant dense<0.000000e+00> : vector<128xf32>
    %13 = vector.multi_reduction <add>, %12, %cst_11 [0] : vector<128x128xf32> to vector<128xf32>
    %14 = vector.shape_cast %13 : vector<128xf32> to vector<1x128xf32>
    %15 = arith.addf %11, %14 : vector<1x128xf32>
    %c0_12 = arith.constant 0 : index
    %c0_13 = arith.constant 0 : index
    %16 = vector.load %arg4[%c0_12, %c0_13] : memref<1x128xf32, #tpu.memory_space<vmem>>, vector<1x128xf32>
    tpu.vector_store %arg4[%c0_12, %c0_13], %15 {strides = array<i32>} : memref<1x128xf32, #tpu.memory_space<vmem>>, vector<1x128xf32>,
    return
  }
  func.func @transform_0(%arg0: i32) -> (i32, i32) {
    %c0_i32 = arith.constant 0 : i32
    %c0_i32_0 = arith.constant 0 : i32
    return %arg0, %c0_i32 : i32, i32
  }
  func.func @transform_1(%arg0: i32) -> (i32, i32) {
    %c0_i32 = arith.constant 0 : i32
    %c0_i32_0 = arith.constant 0 : i32
    %c0_i32_1 = arith.constant 0 : i32
    return %c0_i32, %c0_i32_0 : i32, i32
  }
  func.func @transform_2(%arg0: i32) -> (i32, i32) {
    %c0_i32 = arith.constant 0 : i32
    %c0_i32_0 = arith.constant 0 : i32
    %c0_i32_1 = arith.constant 0 : i32
    return %c0_i32, %c0_i32_0 : i32, i32
  }
  func.func @transform_3(%arg0: i32) -> (i32, i32) {
    %c0_i32 = arith.constant 0 : i32
    %c0_i32_0 = arith.constant 0 : i32
    %c0_i32_1 = arith.constant 0 : i32
    return %c0_i32, %c0_i32_0 : i32, i32
  }
}

</mosaic_0001>

<bundles_post_ra>
// kernel: tpu_custom_call.1
= control target key start
LH: loop header
LB: loop body
LE: loop exit
PB: predicated region body
PF: predicated region fallthrough
CT: control target
= control target key end

     0   :  { %9 = vsyncpa [#allocation3], 0  ;;  %s795_s0 = inlined_call_operand.vmem [shape: bf16[512,36], index: 0, kind: input, shape index: {}]   ;;  %s796_s1 = inlined_call_operand.vmem [shape: bf16[36,128], index: 1, kind: input, shape index: {}]   ;;  %s797_s2 = inlined_call_operand.hbm [shape: f32[1,128], index: 2, kind: output, shape index: {0}]   ;;  %s798_s3 = inlined_call_operand.hbm [shape: f32[1,128], index: 3, kind: output, shape index: {1}]  }
   0x1   :  { %10 = vsyncpa [#allocation5], 0  ;;  %s697_s12 = smov 0  }
   0x2 LB: > { %s703_s13 = sadd.s32 4294967295, %s672_s12   ;;  %p502_p0 = scmp.ge.s32.totalorder %s672_s12, 1  ;;  %s672_s12 = sphi %s697_s12, %s16_s12  }
   0x3   : > { %p133_p1 = scmp.lt.s32.totalorder %s672_s12, 5 }
   0x5   : > { %p134_p2 = pnand %p502_p0, %p133_p1 }
   0x6   : > { %s503_s14 = sshll.u32 (!%p134_p2), %s703_s13, 4  ;;  %p505_p4 = scmp.ne.s32.totalorder (!%p134_p2), %s703_s13, 0 }
   0x7   : > { %137 = sbr.rel (%p134_p2) target bundleno = 331 (0x14b), region = 28  ;;  %p153_p3 = scmp.lt.s32.totalorder (!%p134_p2), %s503_s14, 63 }
   0xe   : > { %s800_s14 = smov (!%p153_p3, %s503_s14), 63  ;;  %162 = sbr.rel (%p505_p4) target bundleno = 21 (0x15), region = 32 }
   0xf   : > { %s504_s15 = sshll.u32 %s800_s14, 2  ;;  %v674_v0 = vmov (!%p505_p4), 0.0  }
  0x10   : > { %s711_s18 = scalar_lea.vmem %s795_s0, %s504_s15  ;;  %163 = vst [vmem:[#allocation2] sm:$0x1] (!%p505_p4), %v674_v0  ;;  %164 = vst [vmem:[#allocation4] sm:$0x1] (!%p505_p4), %v674_v0 }
  0x15 PF: > { %v595_v1 = vld [vmem:[%s796_s1] sm:$0xff]   ;;  %v596_v2 = vld [vmem:[%s796_s1 + $0x8] sm:$0xff]   ;;  %vm241_vm0 = vcmask 293888   ;;  %v597_v3 = vld [vmem:[%s796_s1 + $0x10] ss:$0 sps:$4 sm:$0x33]  }
  0x16   : > { %542 = vmatprep.subr.bf16.mxu0 %v595_v1  ;;  %v598_v4 = vld [vmem:[%s711_s18] sm:$0xff]   ;;  %564 = vmatprep.subr.bf16.mxu1 %v595_v1  ;;  %vm266_vm1 = vcmask 1041408   ;;  %v599_v7 = vld [vmem:[%s711_s18 + $0x8] sm:$0xff]   ;;  %v600_v9 = vld [vmem:[%s711_s18 + $0x10] sm:$0xff]   ;;  %s675_s25 = smov [#allocation2]   ;;  %p580_p5 = scmp.eq.s32.totalorder %s703_s13, 3 }
  0x17   : > { %543 = vmatpush3.bf16.msra.mxu0 %v595_v1  ;;  %567 = vmatpush3.bf16.msra.mxu1 %v595_v1  ;;  %v602_v5 = vld [vmem:[%s711_s18 + $0x20] sm:$0xff]   ;;  %v268_v6 = vsel %vm266_vm1, %v597_v3, 0  ;;  %v603_v8 = vld [vmem:[%s711_s18 + $0x28] sm:$0xff]   ;;  %v604_v10 = vld [vmem:[%s711_s18 + $0x30] sm:$0xff]   ;;  %s438_s26 = sshll.u32 %s675_s25, 4  ;;  %s676_s27 = smov [#allocation4]   ;;  %s439_s26 = int_to_ptr.vmem [resolvable:$true] %s438_s26 }
  0x18   : > { %544 = vmatprep.subr.bf16.mxu0 %v596_v2  ;;  %548 = vmatprep.mubr.msk.bf16.mxu0 %vm241_vm0, %v598_v4  ;;  %v601_v11 = vld [vmem:[%s711_s18 + $0x18] sm:$0xff]   ;;  %s449_s28 = sshll.u32 %s676_s27, 4  ;;  %s606_s29 = scalar_lea.vmem %s439_s26, 16  ;;  %s740_s28 = int_to_ptr.vmem [resolvable:$true] %s449_s28 }
  0x19   : > { %565 = vmatprep.subr.bf16.mxu1 %v596_v2  ;;  %556 = vmatprep.mubr.msk.bf16.mxu1 %vm241_vm0, %v602_v5  ;;  %v605_v12 = vld [vmem:[%s711_s18 + $0x38] sm:$0xff]   ;;  %p607_p6 = scmp.ne.s32.totalorder %s439_s26, %s606_s29  ;;  %s612_s30 = scalar_lea.vmem %s439_s26, 32 }
  0x1a   : > { %p613_p9 = scmp.lt.s32.totalorder %s439_s26, %s439_s26  ;;  %p614_p10 = scmp.lt.s32.totalorder %s612_s30, %s606_s29 }
  0x1b   : > { %545 = vmatpush3.bf16.msra.mxu0 %v596_v2  ;;  %568 = vmatpush3.bf16.msra.mxu1 %v596_v2  ;;  %p608_p7 = pnand %p607_p6, %p580_p5 }
  0x1c   : > { %570 = vmatprep.subr.msk.bf16.mxu0 %vm266_vm1, %v597_v3  ;;  %571 = vmatprep.subr.msk.bf16.mxu1 %vm266_vm1, %v597_v3  ;;  %p615_p11 = por %p614_p10, %p613_p9 }
  0x1d   : > { %p609_p8 = pneg %p608_p7 }
  0x1f   : > { %547 = vmatpush3.bf16.msra.mxu0 %v268_v6  ;;  %569 = vmatpush3.bf16.msra.mxu1 %v268_v6  ;;  %p616_p12 = pnand %p615_p11, %p609_p8 }
  0x22   : > { %549 = vmatmul.mubr.msk.bf16.vlgmr.msra.gmra.mrb[0].mxu0 %vm241_vm0, %v599_v7  ;;  %557 = vmatmul.mubr.msk.bf16.vlgmr.msra.gmra.mrb[0].mxu1 %vm241_vm0, %v603_v8 }
  0x23   : > { %552 = vmatprep.mubr.msk.bf16.mxu0 %vm241_vm0, %v600_v9  ;;  %560 = vmatprep.mubr.msk.bf16.mxu1 %vm241_vm0, %v604_v10 }
  0x2a   : > { %553 = vmatmul.mubr.msk.bf16.gmra.mrb[4].mxu0 %vm241_vm0, %v601_v11  ;;  %561 = vmatmul.mubr.msk.bf16.gmra.mrb[4].mxu1 %vm241_vm0, %v605_v12 }
  0xf5   : > { %v550_v13 = vpop.f32.mrb[0].mxu0  ;;  %v558_v14 = vpop.f32.mrb[0].mxu1 }
  0xf6   : > { %v304_v15 = vpop.f32.mrb[1].mxu0  ;;  %v336_v16 = vpop.f32.mrb[1].mxu1  ;;  %v394_v24 = vmul.f32 %v550_v13, %v550_v13  ;;  %v402_v56 = vmul.f32 %v558_v14, %v558_v14 }
  0xf7   : > { %v551_v17 = vpop.f32.mrb[2].mxu0  ;;  %v559_v18 = vpop.f32.mrb[2].mxu1  ;;  %v392_v21 = vmul.f32 %v304_v15, %v304_v15  ;;  %v400_v50 = vmul.f32 %v336_v16, %v336_v16 }
  0xf8   : > { %v307_v19 = vpop.f32.mrb[3].mxu0  ;;  %v339_v20 = vpop.f32.mrb[3].mxu1  ;;  %v395_v27 = vmul.f32 %v551_v17, %v551_v17  ;;  %v403_v59 = vmul.f32 %v559_v18, %v559_v18 }
  0xf9   : > { %v368_v22 = vadd.f32 %v307_v19, %v304_v15  ;;  %v393_v23 = vmul.f32 %v307_v19, %v307_v19  ;;  %v401_v55 = vmul.f32 %v339_v20, %v339_v20 }
  0xfb   : > { %v369_v25 = vadd.f32 %v550_v13, %v368_v22  ;;  %v408_v26 = vadd.f32 %v393_v23, %v392_v21  ;;  %v391_v23 = vld [vmem:[#allocation4] sm:$0x1] }
  0xfd   : > { %v409_v28 = vadd.f32 %v408_v26, %v394_v24  ;;  %v554_v29 = vpop.f32.mrb[4].mxu0  ;;  %v370_v30 = vadd.f32 %v551_v17, %v369_v25  ;;  %v562_v31 = vpop.f32.mrb[4].mxu1 }
  0xfe   : > { %v320_v32 = vpop.f32.mrb[5].mxu0  ;;  %v352_v33 = vpop.f32.mrb[5].mxu1  ;;  %v398_v44 = vmul.f32 %v554_v29, %v554_v29  ;;  %v406_v4 = vmul.f32 %v562_v31, %v562_v31 }
  0xff   : > { %v371_v34 = vadd.f32 %v370_v30, %v320_v32  ;;  %v396_v35 = vmul.f32 %v320_v32, %v320_v32  ;;  %v410_v36 = vadd.f32 %v409_v28, %v395_v27  ;;  %v555_v37 = vpop.f32.mrb[6].mxu0  ;;  %v563_v38 = vpop.f32.mrb[6].mxu1  ;;  %v404_v62 = vmul.f32 %v352_v33, %v352_v33 }
 0x100   : > { %v323_v39 = vpop.f32.mrb[7].mxu0  ;;  %v355_v40 = vpop.f32.mrb[7].mxu1  ;;  %v399_v47 = vmul.f32 %v555_v37, %v555_v37  ;;  %v407_v7 = vmul.f32 %v563_v38, %v563_v38 }
 0x101   : > { %v411_v41 = vadd.f32 %v410_v36, %v396_v35  ;;  %v372_v42 = vadd.f32 %v371_v34, %v323_v39  ;;  %v397_v43 = vmul.f32 %v323_v39, %v323_v39  ;;  %v405_v3 = vmul.f32 %v355_v40, %v355_v40 }
 0x103   : > { %v373_v45 = vadd.f32 %v554_v29, %v372_v42  ;;  %v412_v46 = vadd.f32 %v411_v41, %v397_v43 }
 0x105   : > { %v413_v48 = vadd.f32 %v412_v46, %v398_v44  ;;  %v374_v49 = vadd.f32 %v555_v37, %v373_v45 }
 0x107   : > { %v375_v51 = vadd.f32 %v374_v49, %v336_v16  ;;  %v414_v52 = vadd.f32 %v413_v48, %v399_v47 }
 0x109   : > { %v415_v53 = vadd.f32 %v414_v52, %v400_v50  ;;  %v376_v54 = vadd.f32 %v375_v51, %v339_v20  ;;  %v367_v20 = vld [vmem:[#allocation2] sm:$0x1] }
 0x10b   : > { %v377_v57 = vadd.f32 %v558_v14, %v376_v54  ;;  %v416_v58 = vadd.f32 %v415_v53, %v401_v55 }
 0x10d   : > { %v417_v60 = vadd.f32 %v416_v58, %v402_v56  ;;  %v378_v61 = vadd.f32 %v559_v18, %v377_v57 }
 0x10f   : > { %v379_v63 = vadd.f32 %v378_v61, %v352_v33  ;;  %v418_v0 = vadd.f32 %v417_v60, %v403_v59 }
 0x111   : > { %v419_v1 = vadd.f32 %v418_v0, %v404_v62  ;;  %v380_v2 = vadd.f32 %v379_v63, %v355_v40 }
 0x113   : > { %v381_v5 = vadd.f32 %v562_v31, %v380_v2  ;;  %v420_v6 = vadd.f32 %v419_v1, %v405_v3 }
 0x115   : > { %v382_v8 = vadd.f32 %v563_v38, %v381_v5  ;;  %v421_v9 = vadd.f32 %v420_v6, %v406_v4 }
 0x117   : > { %v383_v10 = vrot.slane %v382_v8, 4  ;;  %v422_v11 = vadd.f32 %v421_v9, %v407_v7 }
 0x119   : > { %v384_v12 = vadd.f32 %v383_v10, %v382_v8  ;;  %v423_v13 = vrot.slane %v422_v11, 4 }
 0x11b   : > { %v385_v14 = vrot.slane %v384_v12, 2  ;;  %v424_v15 = vadd.f32 %v423_v13, %v422_v11 }
 0x11d   : > { %v386_v16 = vadd.f32 %v385_v14, %v384_v12  ;;  %v425_v17 = vrot.slane %v424_v15, 2 }
 0x11f   : > { %v387_v18 = vrot.slane %v386_v16, 1  ;;  %v426_v19 = vadd.f32 %v425_v17, %v424_v15 }
 0x121   : > { %v388_v21 = vadd.f32 %v387_v18, %v386_v16  ;;  %v427_v22 = vrot.slane %v426_v19, 1 }
 0x123   : > { %v389_v24 = vadd.f32 %v388_v21, %v367_v20  ;;  %v428_v25 = vadd.f32 %v427_v22, %v426_v19 }
 0x125   : > { %390 = vst [vmem:[#allocation2] sm:$0x1] %v389_v24  ;;  %v429_v26 = vadd.f32 %v428_v25, %v391_v23 }
 0x126   : > { %619 = shalt.err (!%p616_p12)
}
 0x127   : > { %s620_s6 = scalar_lea.hbm %s797_s2, 16 }
 0x128   : > { %p621_p13 = scmp.ne.s32.totalorder %s797_s2, %s620_s6  ;;  %p626_p2 = scmp.lt.u32.totalorder %s620_s6, %s797_s2 }
 0x12a   : > { %p622_p0 = pnand %p621_p13, %p580_p5 }
 0x12c   : > { %p623_p1 = pneg %p622_p0 }
 0x12e   : > { %p628_p3 = pnand %p626_p2, %p623_p1 }
 0x130   : > { %631 = shalt.err (!%p628_p3)
}
 0x131   : > { %573 = dma.vmem_to_hbm [thread:$0]  (%p580_p5), %s439_s26, 16, %s797_s2, [#allocation3]   ;;  %430 = vst [vmem:[#allocation4] sm:$0x1] %v429_v26 }
 0x132   : > { %s632_s15 = scalar_lea.vmem %s740_s28, 16  ;;  %s638_s16 = scalar_lea.vmem %s740_s28, 32 }
 0x133   : > { %p633_p4 = scmp.ne.s32.totalorder %s740_s28, %s632_s15  ;;  %p639_p8 = scmp.lt.s32.totalorder %s740_s28, %s740_s28 }
 0x134   : > { %p640_p9 = scmp.lt.s32.totalorder %s638_s16, %s632_s15 }
 0x135   : > { %p634_p6 = pnand %p633_p4, %p580_p5 }
 0x136   : > { %p641_p10 = por %p640_p9, %p639_p8 }
 0x137   : > { %p635_p7 = pneg %p634_p6 }
 0x139   : > { %p642_p11 = pnand %p641_p10, %p635_p7 }
 0x13b   : > { %645 = shalt.err (!%p642_p11)
}
 0x13c   : > { %s646_s19 = scalar_lea.hbm %s798_s3, 16 }
 0x13d   : > { %p647_p12 = scmp.ne.s32.totalorder %s798_s3, %s646_s19  ;;  %p652_p1 = scmp.lt.u32.totalorder %s646_s19, %s798_s3 }
 0x13f   : > { %p648_p13 = pnand %p647_p12, %p580_p5 }
 0x141   : > { %p649_p0 = pneg %p648_p13 }
 0x143   : > { %p654_p2 = pnand %p652_p1, %p649_p0 }
 0x145   : > { %657 = shalt.err (!%p654_p2)
}
 0x146   : > { %575 = dma.vmem_to_hbm [thread:$0]  (%p580_p5), %s740_s28, 16, %s798_s3, [#allocation5]  }
 0x147   : > { %663 = dma.done.wait (%p580_p5), [#allocation3], 16  }
 0x148   : > { %665 = vsyncadd (%p580_p5), [#allocation3], 4294967280 }
 0x149   : > { %667 = dma.done.wait (%p580_p5), [#allocation5], 16  }
 0x14a   : > { %669 = vsyncadd (%p580_p5), [#allocation5], 4294967280 }
 0x14b PF: > { %s16_s12 = sadd.s32 1, %s672_s12  }
 0x14c   : > { %p13_p3 = scmp.ge.s32.totalorder %s16_s12, 6  }
 0x14e   :  { %15 = sbr.rel (!%p13_p3) target bundleno = 2 (0x2), region = 67 }
 0x155   :  { %466 = vsyncpa [#allocation3], 1 }
 0x156   :  { %468 = vsyncpa [#allocation3 + $0x1], 1 }
 0x157   :  { %469 = vsyncpa [#allocation5], 1 }

</bundles_post_ra>
